<compile_context>
chip_gen: v5e
topology: v5e:2x2
jax: 0.10.0
libtpu: 0.0.40
codegen_flags: <defaults>
</compile_context>

<pallas_src>
import functools

import jax
import jax.numpy as jnp
import numpy as np
from jax.experimental import pallas as pl
from jax.experimental.pallas import tpu as pltpu  # noqa: F401 (kept for future gridded variant)

EPS = 1e-5
K = 3  # kernel_size=3, stride=1, padding=0, dilation=1, bias=False


def _group_fold(v, group, reps):
    """v: (reps*group, 1) per-row partial sums.  Returns (reps*group, 1) where
    every row holds the total over its group index across the `reps` replicas.
    Uses only static sublane slices + concat (vreg-friendly, no reshape/roll)."""
    if reps == 1:
        return v
    tot = v[0:group, :]
    for r in range(1, reps):
        tot = tot + v[r * group:(r + 1) * group, :]
    return jnp.concatenate([tot] * reps, axis=0)


def _separable_conv_kernel(x_ref, dw_ref, pwb_ref, mask_ref, o_ref,
                           *, N, C, P, W, Ho, Wo):
    # x_ref   : (N*C, H*W)     NCHW input, N and C packed on sublanes, spatial on lanes
    # dw_ref  : (N*C, K*K)     depthwise 3x3 taps, tiled over N
    # pwb_ref : (N*P, N*C)     block-diagonal pointwise weight (kron(I_N, pw))
    # mask_ref: (max(NC,NP),Lp) 0/1 mask of valid flat anchors ((s % W) < Wo)
    # o_ref   : (N*P, Lp)      padded-frame output; wrapper trims junk anchors in XLA
    NC = N * C
    NP = N * P
    Lp = o_ref.shape[1]
    inv_cnt = 1.0 / float(N * Ho * Wo)      # BN counts valid positions only

    dw = dw_ref[...]                        # (N*C, 9)
    pwb = pwb_ref[...]                      # (N*P, N*C)
    mask = mask_ref[...]                    # (rows, Lp) f32 0/1
    rows = mask.shape[0]
    mask_dw = mask if rows == NC else mask[0:NC, :]
    mask_pw = mask if rows == NP else mask[0:NP, :]

    # ---- depthwise 3x3 VALID conv (groups=C, no bias) ------------------------
    # Flat anchor s reads x[s + kh*W + kw] for tap (kh,kw): 9 lane-shifted
    # window reads straight from the VMEM ref, full-sublane 222-lane VPU FMAs,
    # accumulator seeded from tap 0.  Junk anchors are never compacted here —
    # they are only masked out of the BN statistics below.
    acc = None
    for kh in range(K):
        for kw in range(K):
            win = x_ref[:, pl.ds(kh * W + kw, Lp)]                 # (N*C, Lp)
            term = win * dw[:, kh * K + kw:kh * K + kw + 1]        # lane-broadcast tap
            acc = term if acc is None else acc + term

    # ---- depthwise BN (training-mode batch stats, gamma=1, beta=0) + ReLU ----
    accm = acc * mask_dw                                           # zero junk lanes
    s1 = _group_fold(jnp.sum(accm, axis=1, keepdims=True), C, N)   # (N*C, 1)
    s2 = _group_fold(jnp.sum(accm * accm, axis=1, keepdims=True), C, N)
    mean1 = s1 * inv_cnt
    var1 = s2 * inv_cnt - mean1 * mean1
    y = jnp.maximum((acc - mean1) * jax.lax.rsqrt(var1 + EPS), 0.0)  # (N*C, Lp)

    # ---- pointwise 1x1 conv: ONE block-diagonal MXU matmul for all N frames --
    # (N*P, N*C) @ (N*C, Lp) -> (N*P, Lp): single push/pop, 222 result lanes.
    z = jnp.dot(pwb, y, preferred_element_type=jnp.float32)         # (N*P, Lp)

    # ---- pointwise BN (batch stats) + ReLU, single wide store ----------------
    zm = z * mask_pw
    t1 = _group_fold(jnp.sum(zm, axis=1, keepdims=True), P, N)      # (N*P, 1)
    t2 = _group_fold(jnp.sum(zm * zm, axis=1, keepdims=True), P, N)
    mean2 = t1 * inv_cnt
    var2 = t2 * inv_cnt - mean2 * mean2
    o_ref[...] = jnp.maximum((z - mean2) * jax.lax.rsqrt(var2 + EPS),
                             0.0).astype(o_ref.dtype)


def separable_conv2d_nchw(x_nchw, dw_oihw, pw_oihw):
    """Fused SeparableConv2d forward. NCHW in, NCHW out (no transposes anywhere).

    x_nchw : (N, C, H, W) f32
    dw_oihw: (C, 1, K, K) depthwise weights (torch layout)
    pw_oihw: (P, C, 1, 1) pointwise weights (torch layout)
    """
    N, C, H, W = x_nchw.shape
    P = pw_oihw.shape[0]
    Ho, Wo = H - (K - 1), W - (K - 1)
    Lp = (Ho - 1) * W + Wo          # flat anchors covering every valid output

    x_flat = x_nchw.reshape(N * C, H * W)                      # free reshape
    dw_rows = jnp.tile(dw_oihw.reshape(C, K * K), (N, 1))      # (N*C, 9)
    pw_blk = jnp.kron(jnp.eye(N, dtype=x_nchw.dtype),
                      pw_oihw.reshape(P, C))                   # (N*P, N*C)

    # 0/1 mask of valid flat anchors; precomputed host-side so the kernel needs
    # no integer iota/remainder, just a multiply when forming BN statistics.
    rows = max(N * C, N * P)
    lane_valid = (jnp.arange(Lp) % W < Wo).astype(x_nchw.dtype)        # (Lp,)
    mask = jnp.broadcast_to(lane_valid[None, :], (rows, Lp))           # (rows, Lp)

    # Whole problem fits one VMEM-resident invocation; BN needs full-batch
    # statistics, so a single block keeps the fusion exact.
    # TODO(synk): at production Xception sizes add a grid over N / output-row
    # tiles with dimension_semantics=("parallel", ...) (2 TCs on v7x), a
    # two-pass BN (stats pass + normalize pass), and vmem_limit_bytes sized for
    # v7x's 64 MiB VMEM (BlockSpec double-buffers each input tile).
    out_pad = pl.pallas_call(
        functools.partial(_separable_conv_kernel,
                          N=N, C=C, P=P, W=W, Ho=Ho, Wo=Wo),
        out_shape=jax.ShapeDtypeStruct((N * P, Lp), x_nchw.dtype),
        in_specs=[
            pl.BlockSpec((N * C, H * W), lambda: (0, 0)),
            pl.BlockSpec((N * C, K * K), lambda: (0, 0)),
            pl.BlockSpec((N * P, N * C), lambda: (0, 0)),
            pl.BlockSpec((rows, Lp), lambda: (0, 0)),
        ],
        out_specs=pl.BlockSpec((N * P, Lp), lambda: (0, 0)),
    )(x_flat, dw_rows, pw_blk, mask)

    # Trim the junk anchors (s % W >= Wo) in XLA: pad the Lp-lane frame to
    # Ho*W, view as rows, drop the last W-Wo columns.  Keeps the kernel's
    # output store full-width; still no transposes.
    out = out_pad.reshape(N, P, Lp)
    out = jnp.pad(out, ((0, 0), (0, 0), (0, Ho * W - Lp)))
    return out.reshape(N, P, Ho, W)[:, :, :, :Wo]


def _reference_nchw(x, dw_oihw, pw_oihw):
    """Pure-JAX/XLA reference matching the PyTorch forward (NCHW)."""
    N, C, H, W = x.shape
    P = pw_oihw.shape[0]
    acc = jax.lax.conv_general_dilated(
        x, dw_oihw, window_strides=(1, 1), padding="VALID",
        dimension_numbers=("NCHW", "OIHW", "NCHW"), feature_group_count=C)
    mean = acc.mean(axis=(0, 2, 3), keepdims=True)
    var = ((acc - mean) ** 2).mean(axis=(0, 2, 3), keepdims=True)
    y = jnp.maximum((acc - mean) / jnp.sqrt(var + EPS), 0.0)
    z = jnp.einsum("nchw,pc->nphw", y, pw_oihw.reshape(P, C))
    mean2 = z.mean(axis=(0, 2, 3), keepdims=True)
    var2 = ((z - mean2) ** 2).mean(axis=(0, 2, 3), keepdims=True)
    return jnp.maximum((z - mean2) / jnp.sqrt(var2 + EPS), 0.0)


if __name__ == "__main__":
    # SeparableConv2d(inplanes=4, planes=8, kernel_size=3, stride=1, padding=0)
    N, C, H, W = 2, 4, 16, 16
    P = 8

    key = jax.random.PRNGKey(0)
    kx, kdw, kpw = jax.random.split(key, 3)

    # Input in PyTorch's NCHW convention.
    x_nchw = jax.random.normal(kx, (N, C, H, W), dtype=jnp.float32)

    # _init_weight(): depthwise/pointwise ~ N(0, 0.33^2); BN gamma=1, beta=0
    # (identity affine, folded out of the kernel). Weights kept in torch layouts.
    dw_w = 0.33 * jax.random.normal(kdw, (C, 1, K, K), dtype=jnp.float32)   # (C,1,3,3)
    pw_w = 0.33 * jax.random.normal(kpw, (P, C, 1, 1), dtype=jnp.float32)   # (P,C,1,1)

    out = separable_conv2d_nchw(x_nchw, dw_w, pw_w)
    out = jax.block_until_ready(out)
    assert out.shape == (N, P, H - 2, W - 2), out.shape

    # Sanity check against a pure-JAX reference.
    ref = _reference_nchw(x_nchw, dw_w, pw_w)
    np.testing.assert_allclose(np.asarray(out), np.asarray(ref), rtol=1e-4, atol=1e-4)

    print("KERNEL_OK")
</pallas_src>

<mosaic_0001>
module attributes {stable_mosaic.version = 11 : i64} {
  func.func @_separable_conv_kernel(%arg0: memref<8x256xf32, #tpu.memory_space<vmem>>, %arg1: memref<8x9xf32, #tpu.memory_space<vmem>>, %arg2: memref<16x8xf32, #tpu.memory_space<vmem>>, %arg3: memref<16x222xf32, #tpu.memory_space<vmem>>, %arg4: memref<16x222xf32, #tpu.memory_space<vmem>>) attributes {dimension_semantics = [], scalar_prefetch = 0 : i64, scratch_operands = 0 : i64, tpu.core_type = #tpu.core_type<tc>} {
    %c0 = arith.constant 0 : index
    %c0_0 = arith.constant 0 : index
    %0 = vector.load %arg1[%c0, %c0_0] : memref<8x9xf32, #tpu.memory_space<vmem>>, vector<8x9xf32>
    %c0_1 = arith.constant 0 : index
    %c0_2 = arith.constant 0 : index
    %1 = vector.load %arg2[%c0_1, %c0_2] : memref<16x8xf32, #tpu.memory_space<vmem>>, vector<16x8xf32>
    %c0_3 = arith.constant 0 : index
    %c0_4 = arith.constant 0 : index
    %2 = vector.load %arg3[%c0_3, %c0_4] : memref<16x222xf32, #tpu.memory_space<vmem>>, vector<16x222xf32>
    %3 = vector.extract_strided_slice %2 {offsets = [0, 0], sizes = [8, 222], strides = [1, 1]} : vector<16x222xf32> to vector<8x222xf32>
    %c0_5 = arith.constant 0 : index
    %c0_6 = arith.constant 0 : index
    %4 = vector.load %arg0[%c0_5, %c0_6] : memref<8x256xf32, #tpu.memory_space<vmem>>, vector<8x222xf32>
    %5 = vector.extract_strided_slice %0 {offsets = [0, 0], sizes = [8, 1], strides = [1, 1]} : vector<8x9xf32> to vector<8x1xf32>
    %6 = vector.broadcast %5 : vector<8x1xf32> to vector<8x222xf32>
    %7 = arith.mulf %4, %6 : vector<8x222xf32>
    %c0_7 = arith.constant 0 : index
    %c1 = arith.constant 1 : index
    %8 = vector.load %arg0[%c0_7, %c1] : memref<8x256xf32, #tpu.memory_space<vmem>>, vector<8x222xf32>
    %9 = vector.extract_strided_slice %0 {offsets = [0, 1], sizes = [8, 1], strides = [1, 1]} : vector<8x9xf32> to vector<8x1xf32>
    %10 = vector.broadcast %9 : vector<8x1xf32> to vector<8x222xf32>
    %11 = arith.mulf %8, %10 : vector<8x222xf32>
    %12 = arith.addf %7, %11 : vector<8x222xf32>
    %c0_8 = arith.constant 0 : index
    %c2 = arith.constant 2 : index
    %13 = vector.load %arg0[%c0_8, %c2] : memref<8x256xf32, #tpu.memory_space<vmem>>, vector<8x222xf32>
    %14 = vector.extract_strided_slice %0 {offsets = [0, 2], sizes = [8, 1], strides = [1, 1]} : vector<8x9xf32> to vector<8x1xf32>
    %15 = vector.broadcast %14 : vector<8x1xf32> to vector<8x222xf32>
    %16 = arith.mulf %13, %15 : vector<8x222xf32>
    %17 = arith.addf %12, %16 : vector<8x222xf32>
    %c0_9 = arith.constant 0 : index
    %c16 = arith.constant 16 : index
    %18 = vector.load %arg0[%c0_9, %c16] : memref<8x256xf32, #tpu.memory_space<vmem>>, vector<8x222xf32>
    %19 = vector.extract_strided_slice %0 {offsets = [0, 3], sizes = [8, 1], strides = [1, 1]} : vector<8x9xf32> to vector<8x1xf32>
    %20 = vector.broadcast %19 : vector<8x1xf32> to vector<8x222xf32>
    %21 = arith.mulf %18, %20 : vector<8x222xf32>
    %22 = arith.addf %17, %21 : vector<8x222xf32>
    %c0_10 = arith.constant 0 : index
    %c17 = arith.constant 17 : index
    %23 = vector.load %arg0[%c0_10, %c17] : memref<8x256xf32, #tpu.memory_space<vmem>>, vector<8x222xf32>
    %24 = vector.extract_strided_slice %0 {offsets = [0, 4], sizes = [8, 1], strides = [1, 1]} : vector<8x9xf32> to vector<8x1xf32>
    %25 = vector.broadcast %24 : vector<8x1xf32> to vector<8x222xf32>
    %26 = arith.mulf %23, %25 : vector<8x222xf32>
    %27 = arith.addf %22, %26 : vector<8x222xf32>
    %c0_11 = arith.constant 0 : index
    %c18 = arith.constant 18 : index
    %28 = vector.load %arg0[%c0_11, %c18] : memref<8x256xf32, #tpu.memory_space<vmem>>, vector<8x222xf32>
    %29 = vector.extract_strided_slice %0 {offsets = [0, 5], sizes = [8, 1], strides = [1, 1]} : vector<8x9xf32> to vector<8x1xf32>
    %30 = vector.broadcast %29 : vector<8x1xf32> to vector<8x222xf32>
    %31 = arith.mulf %28, %30 : vector<8x222xf32>
    %32 = arith.addf %27, %31 : vector<8x222xf32>
    %c0_12 = arith.constant 0 : index
    %c32 = arith.constant 32 : index
    %33 = vector.load %arg0[%c0_12, %c32] : memref<8x256xf32, #tpu.memory_space<vmem>>, vector<8x222xf32>
    %34 = vector.extract_strided_slice %0 {offsets = [0, 6], sizes = [8, 1], strides = [1, 1]} : vector<8x9xf32> to vector<8x1xf32>
    %35 = vector.broadcast %34 : vector<8x1xf32> to vector<8x222xf32>
    %36 = arith.mulf %33, %35 : vector<8x222xf32>
    %37 = arith.addf %32, %36 : vector<8x222xf32>
    %c0_13 = arith.constant 0 : index
    %c33 = arith.constant 33 : index
    %38 = vector.load %arg0[%c0_13, %c33] : memref<8x256xf32, #tpu.memory_space<vmem>>, vector<8x222xf32>
    %39 = vector.extract_strided_slice %0 {offsets = [0, 7], sizes = [8, 1], strides = [1, 1]} : vector<8x9xf32> to vector<8x1xf32>
    %40 = vector.broadcast %39 : vector<8x1xf32> to vector<8x222xf32>
    %41 = arith.mulf %38, %40 : vector<8x222xf32>
    %42 = arith.addf %37, %41 : vector<8x222xf32>
    %c0_14 = arith.constant 0 : index
    %c34 = arith.constant 34 : index
    %43 = vector.load %arg0[%c0_14, %c34] : memref<8x256xf32, #tpu.memory_space<vmem>>, vector<8x222xf32>
    %44 = vector.extract_strided_slice %0 {offsets = [0, 8], sizes = [8, 1], strides = [1, 1]} : vector<8x9xf32> to vector<8x1xf32>
    %45 = vector.broadcast %44 : vector<8x1xf32> to vector<8x222xf32>
    %46 = arith.mulf %43, %45 : vector<8x222xf32>
    %47 = arith.addf %42, %46 : vector<8x222xf32>
    %48 = arith.mulf %47, %3 : vector<8x222xf32>
    %cst = arith.constant dense<0.000000e+00> : vector<8xf32>
    %49 = vector.multi_reduction <add>, %48, %cst [1] : vector<8x222xf32> to vector<8xf32>
    %50 = vector.shape_cast %49 : vector<8xf32> to vector<8x1xf32>
    %51 = vector.extract_strided_slice %50 {offsets = [0, 0], sizes = [4, 1], strides = [1, 1]} : vector<8x1xf32> to vector<4x1xf32>
    %52 = vector.extract_strided_slice %50 {offsets = [4, 0], sizes = [4, 1], strides = [1, 1]} : vector<8x1xf32> to vector<4x1xf32>
    %53 = arith.addf %51, %52 : vector<4x1xf32>
    %54 = tpu.concatenate %53, %53 in 0 : vector<4x1xf32>, vector<4x1xf32> -> vector<8x1xf32>
    %55 = arith.mulf %48, %48 : vector<8x222xf32>
    %cst_15 = arith.constant dense<0.000000e+00> : vector<8xf32>
    %56 = vector.multi_reduction <add>, %55, %cst_15 [1] : vector<8x222xf32> to vector<8xf32>
    %57 = vector.shape_cast %56 : vector<8xf32> to vector<8x1xf32>
    %58 = vector.extract_strided_slice %57 {offsets = [0, 0], sizes = [4, 1], strides = [1, 1]} : vector<8x1xf32> to vector<4x1xf32>
    %59 = vector.extract_strided_slice %57 {offsets = [4, 0], sizes = [4, 1], strides = [1, 1]} : vector<8x1xf32> to vector<4x1xf32>
    %60 = arith.addf %58, %59 : vector<4x1xf32>
    %61 = tpu.concatenate %60, %60 in 0 : vector<4x1xf32>, vector<4x1xf32> -> vector<8x1xf32>
    %cst_16 = arith.constant 0.00255102036 : f32
    %62 = vector.broadcast %cst_16 : f32 to vector<8x1xf32>
    %63 = arith.mulf %54, %62 : vector<8x1xf32>
    %cst_17 = arith.constant 0.00255102036 : f32
    %64 = vector.broadcast %cst_17 : f32 to vector<8x1xf32>
    %65 = arith.mulf %61, %64 : vector<8x1xf32>
    %66 = arith.mulf %63, %63 : vector<8x1xf32>
    %67 = arith.subf %65, %66 : vector<8x1xf32>
    %68 = vector.broadcast %63 : vector<8x1xf32> to vector<8x222xf32>
    %69 = arith.subf %47, %68 : vector<8x222xf32>
    %cst_18 = arith.constant 9.99999974E-6 : f32
    %70 = vector.broadcast %cst_18 : f32 to vector<8x1xf32>
    %71 = arith.addf %67, %70 : vector<8x1xf32>
    %72 = math.rsqrt %71 : vector<8x1xf32>
    %73 = vector.broadcast %72 : vector<8x1xf32> to vector<8x222xf32>
    %74 = arith.mulf %69, %73 : vector<8x222xf32>
    %cst_19 = arith.constant 0.000000e+00 : f32
    %75 = vector.broadcast %cst_19 : f32 to vector<8x222xf32>
    %76 = arith.maximumf %74, %75 : vector<8x222xf32>
    %cst_20 = arith.constant dense<0.000000e+00> : vector<16x222xf32>
    %77 = tpu.matmul %1, %76, %cst_20 {dimension_numbers = #tpu.dot_dimension_numbers<[1], [0], [0], [1], [0, 0, 1, 1], [], []>} : vector<16x8xf32>, vector<8x222xf32>, vector<16x222xf32> -> vector<16x222xf32>
    %78 = arith.mulf %77, %2 : vector<16x222xf32>
    %cst_21 = arith.constant dense<0.000000e+00> : vector<16xf32>
    %79 = vector.multi_reduction <add>, %78, %cst_21 [1] : vector<16x222xf32> to vector<16xf32>
    %80 = vector.shape_cast %79 : vector<16xf32> to vector<16x1xf32>
    %81 = vector.extract_strided_slice %80 {offsets = [0, 0], sizes = [8, 1], strides = [1, 1]} : vector<16x1xf32> to vector<8x1xf32>
    %82 = vector.extract_strided_slice %80 {offsets = [8, 0], sizes = [8, 1], strides = [1, 1]} : vector<16x1xf32> to vector<8x1xf32>
    %83 = arith.addf %81, %82 : vector<8x1xf32>
    %84 = tpu.concatenate %83, %83 in 0 : vector<8x1xf32>, vector<8x1xf32> -> vector<16x1xf32>
    %85 = arith.mulf %78, %78 : vector<16x222xf32>
    %cst_22 = arith.constant dense<0.000000e+00> : vector<16xf32>
    %86 = vector.multi_reduction <add>, %85, %cst_22 [1] : vector<16x222xf32> to vector<16xf32>
    %87 = vector.shape_cast %86 : vector<16xf32> to vector<16x1xf32>
    %88 = vector.extract_strided_slice %87 {offsets = [0, 0], sizes = [8, 1], strides = [1, 1]} : vector<16x1xf32> to vector<8x1xf32>
    %89 = vector.extract_strided_slice %87 {offsets = [8, 0], sizes = [8, 1], strides = [1, 1]} : vector<16x1xf32> to vector<8x1xf32>
    %90 = arith.addf %88, %89 : vector<8x1xf32>
    %91 = tpu.concatenate %90, %90 in 0 : vector<8x1xf32>, vector<8x1xf32> -> vector<16x1xf32>
    %cst_23 = arith.constant 0.00255102036 : f32
    %92 = vector.broadcast %cst_23 : f32 to vector<16x1xf32>
    %93 = arith.mulf %84, %92 : vector<16x1xf32>
    %cst_24 = arith.constant 0.00255102036 : f32
    %94 = vector.broadcast %cst_24 : f32 to vector<16x1xf32>
    %95 = arith.mulf %91, %94 : vector<16x1xf32>
    %96 = arith.mulf %93, %93 : vector<16x1xf32>
    %97 = arith.subf %95, %96 : vector<16x1xf32>
    %98 = vector.broadcast %93 : vector<16x1xf32> to vector<16x222xf32>
    %99 = arith.subf %77, %98 : vector<16x222xf32>
    %cst_25 = arith.constant 9.99999974E-6 : f32
    %100 = vector.broadcast %cst_25 : f32 to vector<16x1xf32>
    %101 = arith.addf %97, %100 : vector<16x1xf32>
    %102 = math.rsqrt %101 : vector<16x1xf32>
    %103 = vector.broadcast %102 : vector<16x1xf32> to vector<16x222xf32>
    %104 = arith.mulf %99, %103 : vector<16x222xf32>
    %cst_26 = arith.constant 0.000000e+00 : f32
    %105 = vector.broadcast %cst_26 : f32 to vector<16x222xf32>
    %106 = arith.maximumf %104, %105 : vector<16x222xf32>
    %c0_27 = arith.constant 0 : index
    %c0_28 = arith.constant 0 : index
    %107 = vector.load %arg4[%c0_27, %c0_28] : memref<16x222xf32, #tpu.memory_space<vmem>>, vector<16x222xf32>
    tpu.vector_store %arg4[%c0_27, %c0_28], %106 {strides = array<i32>} : memref<16x222xf32, #tpu.memory_space<vmem>>, vector<16x222xf32>,
    return
  }
}

</mosaic_0001>

<bundles_post_ra>
// kernel: tpu_custom_call.1
= control target key start
LH: loop header
LB: loop body
LE: loop exit
PB: predicated region body
PF: predicated region fallthrough
CT: control target
= control target key end

     0   :  { %9 = vsyncpa [#allocation3], 0  ;;  %s584_s0 = inlined_call_operand.vmem [shape: f32[8,256], index: 0, kind: input, shape index: {}]   ;;  %s585_s1 = inlined_call_operand.vmem [shape: f32[8,9], index: 1, kind: input, shape index: {}]   ;;  %s586_s2 = inlined_call_operand.vmem [shape: f32[16,8], index: 2, kind: input, shape index: {}]   ;;  %s587_s3 = inlined_call_operand.hbm [shape: f32[16,222], index: 3, kind: input, shape index: {}]   ;;  %s588_s4 = inlined_call_operand.hbm [shape: f32[16,222], index: 4, kind: output, shape index: {}]  }
   0x1   :  { %10 = vsyncpa [#allocation4], 0  ;;  %s21_s17 = sshll.u32 %s587_s3, 4  ;;  %s487_s18 = smov [#allocation2]   ;;  %s22_s17 = int_to_ptr.hbm [resolvable:$true] %s21_s17 }
   0x2   :  { %s23_s19 = sshll.u32 %s487_s18, 4  ;;  %s488_s20 = smov 256   ;;  %s24_s19 = int_to_ptr.vmem [resolvable:$true] %s23_s19 }
   0x3   :  { %s489_s21 = smov 16  }
   0x4   :  { %29 = dma.hbm_to_vmem [thread:$0]  %s22_s17, 512, %s24_s19, [#allocation3], %s488_s20, %s488_s20, %s489_s21  }
   0x5   :  { %483 = dma.done.wait [#allocation3], 512  }
   0x6   :  { %484 = vsyncadd [#allocation3], 4294966784  ;;  %v490_v0 = vmov 3   ;;  %v491_v1 = vmov 1   ;;  %v492_v2 = vmov 5   ;;  %v34_v3 = vld [vmem:[%s585_s1] sm:$0xff] }
   0x7   :  { %422 = vset.pattern.permute.xlu1 %v490_v0  ;;  %420 = vset.pattern.permute.xlu0 %v491_v1  ;;  %v493_v4 = vmov 4   ;;  %v494_v5 = vmov 2   ;;  %v495_v6 = vmov 6   ;;  %v496_v7 = vmov 7   ;;  %v545_v10 = vld [vmem:[%s584_s0] sm:$0xff]  ;;  %v42_v11 = vld [vmem:[%s584_s0 + $0x8] sm:$0xff] }
   0x8   :  { %424 = vset.pattern.permute.xlu2 %v492_v2  ;;  %87 = vperm.xlu1 %422, %v34_v3   ;;  %v497_v8 = vmov 0   ;;  %v498_v9 = vmov 8   ;;  %s499_s26 = smov 127   ;;  %s500_s27 = smov 112   ;;  %vm62_vm0 = vcmask 1039360   ;;  %vm80_vm1 = vcmask 1031168  }
   0x9   :  { %51 = vperm.xlu0 %420, %v34_v3   ;;  %123 = vperm.xlu2 %424, %v34_v3   ;;  %s501_s0 = smov 111   ;;  %s502_s28 = smov 126   ;;  %vm98_vm2 = vcmask 916480   ;;  %vm116_vm3 = vcmask 908288   ;;  %vm134_vm4 = vcmask 900096   ;;  %vm152_vm5 = vcmask 785408  }
   0xa   :  { %s503_s29 = smov 96   ;;  %s504_s30 = smov 95   ;;  %vm170_vm6 = vcmask 777216   ;;  %vm188_vm7 = vcmask 769024   ;;  %vm207_vm8 = vcmask 1043456   ;;  %vm254_vm12 = vcmask 64512  }
   0xb   :  { %s505_s5 = smov 110   ;;  %s506_s6 = smov 94  }
   0xc   :  { %s380_s14 = sshll.u32 %s588_s4, 4  ;;  %s381_s14 = int_to_ptr.hbm [resolvable:$true] %s380_s14 }
  0x10   :  { %423 = vset.pattern.permute.xlu1 %v493_v4 }
  0x11   :  { %421 = vset.pattern.permute.xlu0 %v494_v5  ;;  %105 = vperm.xlu1 %423, %v34_v3  }
  0x12   :  { %69 = vperm.xlu0 %421, %v34_v3   ;;  %425 = vset.pattern.permute.xlu2 %v495_v6 }
  0x13   :  { %141 = vperm.xlu2 %425, %v34_v3  }
  0x19   :  { %426 = vset.pattern.permute.xlu1 %v496_v7 }
  0x1a   :  { %428 = vset.pattern.permute.xlu0 %v497_v8  ;;  %159 = vperm.xlu1 %426, %v34_v3  }
  0x1b   :  { %45 = vperm.xlu0 %428, %v34_v3   ;;  %427 = vset.pattern.permute.xlu2 %v498_v9  ;;  %v559_v9 = vld [vmem:[#allocation2 + $0x8] sm:$0xff] }
  0x1c   :  { %177 = vperm.xlu2 %427, %v34_v3  }
  0x22   :  { %430 = vset.pattern.permute.xlu1 %v497_v8 }
  0x24   :  { %429 = vset.pattern.permute.xlu2 %v497_v8 }
  0x63   :  { %v124_v17 = vpop.permute.xlu2 %123 }
  0x64   :  { %v127_v29 = vmul.f32 %v124_v17, %v42_v11  ;;  %v126_v30 = vmul.f32 %v124_v17, %v545_v10 }
  0x6d   :  { %v142_v23 = vpop.permute.xlu2 %141 }
  0x6e   :  { %v144_v25 = vmul.f32 %v142_v23, %v545_v10  ;;  %v145_v32 = vmul.f32 %v142_v23, %v42_v11 }
  0x76   :  { %v178_v33 = vpop.permute.xlu2 %177 }
  0x77   :  { %v181_v34 = vmul.f32 %v178_v33, %v42_v11  ;;  %v180_v35 = vmul.f32 %v178_v33, %v545_v10 }
  0x7a   :  { %v88_v13 = vpop.permute.xlu1 %87 }
  0x7b   :  { %v52_v12 = vpop.permute.xlu0 %51  ;;  %v90_v16 = vmul.f32 %v88_v13, %v545_v10  ;;  %v91_v26 = vmul.f32 %v88_v13, %v42_v11 }
  0x7c   :  { %v54_v14 = vmul.f32 %v52_v12, %v545_v10  ;;  %v55_v15 = vmul.f32 %v52_v12, %v42_v11 }
  0x7d   :  { %94 = vrot.lane.b32.xlu0 %v90_v16, %s500_s27  ;;  %v37_v16 = vld [vmem:[#allocation2] sm:$0xff] }
  0x7e   :  { %60 = vrot.lane.b32.xlu2 %v55_v15, %s499_s26  ;;  %58 = vrot.lane.b32.xlu1 %v54_v14, %s499_s26 }
  0x83   :  { %v106_v18 = vpop.permute.xlu1 %105 }
  0x84   :  { %v70_v19 = vpop.permute.xlu0 %69  ;;  %v109_v20 = vmul.f32 %v106_v18, %v42_v11  ;;  %v108_v24 = vmul.f32 %v106_v18, %v545_v10 }
  0x85   :  { %v72_v21 = vmul.f32 %v70_v19, %v545_v10  ;;  %v73_v22 = vmul.f32 %v70_v19, %v42_v11 }
  0x86   :  { %114 = vrot.lane.b32.xlu0 %v109_v20, %s501_s0 }
  0x87   :  { %78 = vrot.lane.b32.xlu2 %v73_v22, %s502_s28  ;;  %76 = vrot.lane.b32.xlu1 %v72_v21, %s502_s28 }
  0x8c   :  { %v160_v27 = vpop.permute.xlu1 %159 }
  0x8d   :  { %v163_v28 = vmul.f32 %v160_v27, %v42_v11  ;;  %v162_v31 = vmul.f32 %v160_v27, %v545_v10  ;;  %v46_v37 = vpop.permute.xlu0 %45 }
  0x8e   :  { %148 = vrot.lane.b32.xlu0 %v144_v25, %s503_s29  ;;  %v49_v44 = vmul.f32 %v46_v37, %v42_v11  ;;  %v48_v48 = vmul.f32 %v46_v37, %v545_v10 }
  0x8f   :  { %112 = vrot.lane.b32.xlu2 %v108_v24, %s501_s0  ;;  %96 = vrot.lane.b32.xlu1 %v91_v26, %s500_s27 }
  0x96   :  { %168 = vrot.lane.b32.xlu0 %v163_v28, %s504_s30 }
  0x97   :  { %132 = vrot.lane.b32.xlu2 %v127_v29, %s505_s5  ;;  %130 = vrot.lane.b32.xlu1 %v126_v30, %s505_s5 }
  0x9f   :  { %166 = vrot.lane.b32.xlu2 %v162_v31, %s504_s30  ;;  %150 = vrot.lane.b32.xlu1 %v145_v32, %s503_s29 }
  0xa7   :  { %186 = vrot.lane.b32.xlu2 %v181_v34, %s506_s6  ;;  %184 = vrot.lane.b32.xlu1 %v180_v35, %s506_s6 }
  0xd8   :  { %v61_v36 = vpop.permute.xlu2 %60 }
  0xd9   :  { %v67_v47 = vadd.f32 %v61_v36, %v49_v44 }
  0xe1   :  { %v79_v38 = vpop.permute.xlu2 %78 }
  0xe2   :  { %v85_v49 = vadd.f32 %v79_v38, %v67_v47 }
  0xe9   :  { %v113_v41 = vpop.permute.xlu2 %112 }
  0xef   :  { %v95_v40 = vpop.permute.xlu0 %94 }
  0xf0   :  { %v59_v39 = vpop.permute.xlu1 %58 }
  0xf1   :  { %v133_v45 = vpop.permute.xlu2 %132  ;;  %v63_v50 = vsel %vm62_vm0, %v59_v39, %v61_v36 }
  0xf2   :  { %v66_v53 = vadd.f32 %v63_v50, %v48_v48 }
  0xf8   :  { %v115_v43 = vpop.permute.xlu0 %114 }
  0xf9   :  { %v77_v42 = vpop.permute.xlu1 %76  ;;  %v167_v57 = vpop.permute.xlu2 %166  ;;  %v117_v61 = vsel %vm116_vm3, %v113_v41, %v115_v43 }
  0xfa   :  { %v81_v51 = vsel %vm80_vm1, %v77_v42, %v79_v38 }
  0xfb   :  { %v84_v58 = vadd.f32 %v81_v51, %v66_v53 }
 0x100   :  { %v149_v54 = vpop.permute.xlu0 %148 }
 0x101   :  { %v97_v46 = vpop.permute.xlu1 %96  ;;  %v187_v7 = vpop.permute.xlu2 %186 }
 0x102   :  { %v103_v52 = vadd.f32 %v97_v46, %v85_v49  ;;  %v99_v56 = vsel %vm98_vm2, %v95_v40, %v97_v46 }
 0x103   :  { %v102_v60 = vadd.f32 %v99_v56, %v84_v58  ;;  %v35_v56 = vld [vmem:[%s586_s2] sm:$0xff] }
 0x104   :  { %v121_v59 = vadd.f32 %v115_v43, %v103_v52 }
 0x105   :  { %v120_v0 = vadd.f32 %v117_v61, %v102_v60 }
 0x106   :  { %v139_v63 = vadd.f32 %v133_v45, %v121_v59 }
 0x108   :  { %v169_v5 = vpop.permute.xlu0 %168 }
 0x109   :  { %v131_v55 = vpop.permute.xlu1 %130  ;;  %v171_v11 = vsel %vm170_vm6, %v167_v57, %v169_v5 }
 0x10a   :  { %v135_v62 = vsel %vm134_vm4, %v131_v55, %v133_v45  ;;  %v36_v55 = vld [vmem:[%s586_s2 + $0x8] sm:$0xff]  ;;  %s507_s2 = smov [#allocation5]  }
 0x10b   :  { %v138_v4 = vadd.f32 %v135_v62, %v120_v0  ;;  %v40_v62 = vld [vmem:[#allocation2 + $0x18] sm:$0xff]  ;;  %v39_v0 = vld [vmem:[#allocation2 + $0x10] sm:$0xff]  ;;  %s378_s11 = sshll.u32 %s507_s2, 4  ;;  %s379_s11 = int_to_ptr.vmem [resolvable:$true] %s378_s11 }
 0x111   :  { %v151_v1 = vpop.permute.xlu1 %150 }
 0x112   :  { %v153_v2 = vsel %vm152_vm5, %v149_v54, %v151_v1  ;;  %v157_v3 = vadd.f32 %v151_v1, %v139_v63 }
 0x113   :  { %v156_v8 = vadd.f32 %v153_v2, %v138_v4 }
 0x114   :  { %v175_v6 = vadd.f32 %v169_v5, %v157_v3 }
 0x115   :  { %v174_v14 = vadd.f32 %v171_v11, %v156_v8 }
 0x116   :  { %v193_v10 = vadd.f32 %v187_v7, %v175_v6 }
 0x118   :  { %v195_v12 = vmul.f32 %v193_v10, %v559_v9 }
 0x119   :  { %v185_v13 = vpop.permute.xlu1 %184 }
 0x11a   :  { %v189_v15 = vsel %vm188_vm7, %v185_v13, %v187_v7  ;;  %v210_v18 = vmul.f32 %v195_v12, %v195_v12  ;;  %v196_v20 = vsel %vm188_vm7, %v195_v12, 0.0 }
 0x11b   :  { %v192_v17 = vadd.f32 %v189_v15, %v174_v14 }
 0x11c   :  { %v211_v23 = vsel %vm188_vm7, %v210_v18, 0.0 }
 0x11d   :  { %v194_v19 = vmul.f32 %v192_v17, %v37_v16 }
 0x11f   :  { %v197_v21 = vadd.f32 %v196_v20, %v194_v19  ;;  %v209_v22 = vmul.f32 %v194_v19, %v194_v19 }
 0x121   :  { %198 = vadd.xlane.f32.xlu0 %v197_v21  ;;  %v212_v24 = vadd.f32 %v211_v23, %v209_v22 }
 0x123   :  { %213 = vadd.xlane.f32.xlu1 %v212_v24 }
 0x194   :  { %v199_v25 = vpop.xlane.xlu0 %198 }
 0x195   :  { %v201_v26 = vrot.slane %v199_v25, 4 }
 0x196   :  { %v214_v27 = vpop.xlane.xlu1 %213 }
 0x197   :  { %v203_v28 = vadd.f32 %v201_v26, %v199_v25  ;;  %v216_v29 = vrot.slane %v214_v27, 4 }
 0x199   :  { %v205_v30 = vrot.slane %v203_v28, 4  ;;  %v218_v31 = vadd.f32 %v216_v29, %v214_v27 }
 0x19b   :  { %v220_v32 = vrot.slane %v218_v31, 4  ;;  %v208_v33 = vsel %vm207_vm8, %v203_v28, %v205_v30 }
 0x19c   :  { %v223_v34 = vmul.f32 0.0025510204, %v208_v33 }
 0x19d   :  { %v222_v35 = vsel %vm207_vm8, %v218_v31, %v220_v32 }
 0x19e   :  { %v224_v36 = vmul.f32 0.0025510204, %v222_v35  ;;  %229 = vperm.xlu2 %429, %v223_v34   ;;  %v225_v37 = vmul.f32 %v223_v34, %v223_v34 }
 0x1a0   :  { %v226_v38 = vsub.f32 %v224_v36, %v225_v37 }
 0x1a2   :  { %v234_v39 = vadd.f32 1e-05, %v226_v38 }
 0x1a4   :  { %431 = vrsqrt.f32 %v234_v39  ;;  %vm241_vm10 = vweird.f32 %v234_v39 }
 0x1aa   :  { %v432_v40 = vpop.eup %431 }
 0x1ab   :  { %v236_v41 = vmul.f32 %v432_v40, %v234_v39  ;;  %vm242_vm9 = vweird.f32 %v432_v40 }
 0x1ac   :  { %vm243_vm11 = vmor %vm241_vm10, %vm242_vm9 }
 0x1ad   :  { %v237_v42 = vmul.f32 %v432_v40, %v236_v41 }
 0x1af   :  { %v238_v43 = vmul.f32 0.5, %v237_v42 }
 0x1b1   :  { %v239_v44 = vsub.f32 1.5, %v238_v43 }
 0x1b3   :  { %v240_v45 = vmul.f32 %v432_v40, %v239_v44 }
 0x1b5   :  { %v244_v46 = vsel %vm243_vm11, %v432_v40, %v240_v45 }
 0x1b6   :  { %247 = vperm.xlu2 %429, %v244_v46  }
 0x1f8   :  { %v230_v47 = vpop.permute.xlu2 %229 }
 0x1f9   :  { %v232_v48 = vsub.f32 %v192_v17, %v230_v47  ;;  %v233_v49 = vsub.f32 %v193_v10, %v230_v47 }
 0x210   :  { %v248_v50 = vpop.permute.xlu2 %247 }
 0x211   :  { %v250_v51 = vmul.f32 %v248_v50, %v232_v48  ;;  %v251_v52 = vmul.f32 %v248_v50, %v233_v49 }
 0x213   :  { %v252_v53 = vmax.f32 %v250_v51, 0.0  ;;  %v253_v54 = vmax.f32 %v251_v52, 0.0 }
 0x215   :  { %276 = vmatpush.msra.mxu0 %v252_v53  ;;  %397 = vmatpush.msra.mxu2 %v252_v53 }
 0x216   :  { %299 = vmatpush.msra.mxu1 %v253_v54  ;;  %398 = vmatpush.msra.mxu3 %v253_v54 }
 0x217   :  { %396 = vmatmul.msk.f32.vlgmr.msra.gmra.mxu3 %vm254_vm12, %v36_v55  ;;  %394 = vmatmul.msk.f32.vlgmr.msra.gmra.mxu2 %vm254_vm12, %v36_v55 }
 0x218   :  { %395 = vmatmul.msk.f32.vlgmr.msra.gmra.mxu1 %vm254_vm12, %v35_v56  ;;  %393 = vmatmul.msk.f32.vlgmr.msra.gmra.mxu0 %vm254_vm12, %v35_v56 }
 0x295   :  { %v301_v57 = vpop.f32.mrf.mxu1  ;;  %v278_v58 = vpop.f32.mrf.mxu0 }
 0x296   :  { %v308_v59 = vmul.f32 %v301_v57, %v559_v9  ;;  %v307_v60 = vmul.f32 %v278_v58, %v37_v16 }
 0x298   :  { %v321_v61 = vmul.f32 %v308_v59, %v308_v59  ;;  %v320_v63 = vmul.f32 %v307_v60, %v307_v60  ;;  %v311_v1 = vsel %vm188_vm7, %v308_v59, 0.0 }
 0x299   :  { %v312_v2 = vadd.f32 %v311_v1, %v307_v60 }
 0x29a   :  { %v304_v3 = vpop.f32.mrf.mxu3  ;;  %v281_v4 = vpop.f32.mrf.mxu2  ;;  %v324_v5 = vsel %vm188_vm7, %v321_v61, 0.0 }
 0x29b   :  { %v310_v6 = vmul.f32 %v304_v3, %v40_v62  ;;  %v309_v7 = vmul.f32 %v281_v4, %v39_v0  ;;  %313 = vadd.xlane.f32.xlu2 %v312_v2  ;;  %v325_v8 = vadd.f32 %v324_v5, %v320_v63 }
 0x29d   :  { %v315_v10 = vsel %vm188_vm7, %v310_v6, 0.0  ;;  %326 = vadd.xlane.f32.xlu1 %v325_v8  ;;  %v323_v11 = vmul.f32 %v310_v6, %v310_v6  ;;  %v322_v12 = vmul.f32 %v309_v7, %v309_v7 }
 0x29e   :  { %v316_v9 = vadd.f32 %v315_v10, %v309_v7 }
 0x29f   :  { %v328_v13 = vsel %vm188_vm7, %v323_v11, 0.0 }
 0x2a0   :  { %317 = vadd.xlane.f32.xlu0 %v316_v9  ;;  %v329_v14 = vadd.f32 %v328_v13, %v322_v12 }
 0x2a8   :  { %330 = vadd.xlane.f32.xlu0 %v329_v14 }
 0x30e   :  { %v314_v15 = vpop.xlane.xlu2 %313 }
 0x310   :  { %v327_v19 = vpop.xlane.xlu1 %326 }
 0x313   :  { %v318_v16 = vpop.xlane.xlu0 %317 }
 0x314   :  { %v319_v17 = vadd.f32 %v318_v16, %v314_v15 }
 0x316   :  { %v333_v18 = vmul.f32 0.0025510204, %v319_v17 }
 0x318   :  { %339 = vperm.xlu1 %430, %v333_v18   ;;  %v335_v22 = vmul.f32 %v333_v18, %v333_v18 }
 0x31b   :  { %v331_v20 = vpop.xlane.xlu0 %330 }
 0x31c   :  { %v332_v21 = vadd.f32 %v331_v20, %v327_v19 }
 0x31e   :  { %v334_v23 = vmul.f32 0.0025510204, %v332_v21 }
 0x320   :  { %v336_v24 = vsub.f32 %v334_v23, %v335_v22 }
 0x322   :  { %v346_v25 = vadd.f32 1e-05, %v336_v24 }
 0x324   :  { %433 = vrsqrt.f32 %v346_v25  ;;  %vm353_vm14 = vweird.f32 %v346_v25 }
 0x32a   :  { %v434_v26 = vpop.eup %433 }
 0x32b   :  { %v348_v27 = vmul.f32 %v434_v26, %v346_v25  ;;  %vm354_vm13 = vweird.f32 %v434_v26 }
 0x32c   :  { %vm355_vm15 = vmor %vm353_vm14, %vm354_vm13 }
 0x32d   :  { %v349_v28 = vmul.f32 %v434_v26, %v348_v27 }
 0x32f   :  { %v350_v29 = vmul.f32 0.5, %v349_v28 }
 0x331   :  { %v351_v30 = vsub.f32 1.5, %v350_v29 }
 0x333   :  { %v352_v31 = vmul.f32 %v434_v26, %v351_v30 }
 0x335   :  { %v356_v32 = vsel %vm355_vm15, %v434_v26, %v352_v31 }
 0x336   :  { %359 = vperm.xlu2 %429, %v356_v32  }
 0x38a   :  { %v340_v33 = vpop.permute.xlu1 %339 }
 0x38b   :  { %v342_v34 = vsub.f32 %v278_v58, %v340_v33  ;;  %v343_v35 = vsub.f32 %v301_v57, %v340_v33  ;;  %v344_v36 = vsub.f32 %v281_v4, %v340_v33  ;;  %v345_v37 = vsub.f32 %v304_v3, %v340_v33 }
 0x390   :  { %v360_v38 = vpop.permute.xlu2 %359 }
 0x391   :  { %v362_v39 = vmul.f32 %v360_v38, %v342_v34  ;;  %v363_v40 = vmul.f32 %v360_v38, %v343_v35  ;;  %v364_v41 = vmul.f32 %v360_v38, %v344_v36  ;;  %v365_v42 = vmul.f32 %v360_v38, %v345_v37 }
 0x393   :  { %v366_v43 = vmax.f32 %v362_v39, 0.0  ;;  %v367_v44 = vmax.f32 %v363_v40, 0.0  ;;  %v368_v45 = vmax.f32 %v364_v41, 0.0  ;;  %v369_v46 = vmax.f32 %v365_v42, 0.0 }
 0x395   :  { %370 = vst [vmem:[#allocation5] sm:$0xff] %v366_v43 }
 0x396   :  { %371 = vst.msk [vmem:[#allocation5 + $0x8] sm:$0xff] %vm188_vm7, %v367_v44 }
 0x397   :  { %372 = vst [vmem:[#allocation5 + $0x10] sm:$0xff] %v368_v45 }
 0x398   :  { %373 = vst.msk [vmem:[#allocation5 + $0x18] sm:$0xff] %vm188_vm7, %v369_v46 }
 0x399   :  { %386 = dma.vmem_to_hbm [thread:$0]  %s379_s11, 512, %s381_s14, [#allocation4], %s488_s20, %s488_s20, %s489_s21  }
 0x39a   :  { %485 = dma.done.wait [#allocation4], 512  }
 0x39b   :  { %486 = vsyncadd [#allocation4], 4294966784 }
 0x39c   :  { %391 = vsyncpa [#allocation3], 1 }
 0x39d   :  { %392 = vsyncpa [#allocation4], 1 }

</bundles_post_ra>
